<compile_context>
chip_gen: v6e
topology: v6e:2x2x1
jax: 0.10.0
libtpu: 0.0.40
codegen_flags: <defaults>
</compile_context>

<pallas_src>
import functools
import math

import numpy as np
import jax
import jax.numpy as jnp
from jax.experimental import pallas as pl
from jax.experimental.pallas import tpu as pltpu


# ----------------------------- parameter setup -----------------------------

def _round_up(x: int, m: int) -> int:
    return ((x + m - 1) // m) * m


def _hann_window(win_length: int) -> np.ndarray:
    # torch.hann_window(periodic=True)
    n = np.arange(win_length, dtype=np.float64)
    return (0.5 - 0.5 * np.cos(2.0 * np.pi * n / win_length)).astype(np.float32)


def _mel_fbanks(n_freqs: int, f_min: float, f_max: float, n_mels: int,
                sample_rate: int) -> np.ndarray:
    """torchaudio.functional.melscale_fbanks (htk scale, norm=None)."""
    def hz_to_mel(f):
        return 2595.0 * np.log10(1.0 + np.asarray(f, dtype=np.float64) / 700.0)

    def mel_to_hz(m):
        return 700.0 * (10.0 ** (np.asarray(m, dtype=np.float64) / 2595.0) - 1.0)

    all_freqs = np.linspace(0.0, sample_rate // 2, n_freqs)
    m_pts = np.linspace(hz_to_mel(f_min), hz_to_mel(f_max), n_mels + 2)
    f_pts = mel_to_hz(m_pts)
    f_diff = f_pts[1:] - f_pts[:-1]                       # (n_mels+1,)
    slopes = f_pts[None, :] - all_freqs[:, None]          # (n_freqs, n_mels+2)
    down = -slopes[:, :-2] / f_diff[:-1]
    up = slopes[:, 2:] / f_diff[1:]
    fb = np.maximum(0.0, np.minimum(down, up))
    return fb.astype(np.float32)                          # (n_freqs, n_mels)


def _dft_bases(n_fft: int, n_freqs: int, window: np.ndarray):
    """Real/imag DFT bases with the analysis window folded in."""
    n = np.arange(n_fft, dtype=np.float64)[:, None]        # (n_fft, 1)
    k = np.arange(n_freqs, dtype=np.float64)[None, :]      # (1, n_freqs)
    ang = 2.0 * np.pi * n * k / n_fft
    cos_b = (np.cos(ang) * window[:, None]).astype(np.float32)
    sin_b = (np.sin(ang) * window[:, None]).astype(np.float32)
    return cos_b, sin_b                                    # (n_fft, n_freqs)


# ------------------------------- Pallas kernel ------------------------------

def _logmel_kernel(frames_ref, dft_ref, mel_ref, out_ref, *, n_freqs_pad):
    # frames: (TILE_T, n_fft_pad) bf16; dft: (n_fft_pad, 2*n_freqs_pad) bf16
    re_im = jnp.dot(frames_ref[...], dft_ref[...],
                    preferred_element_type=jnp.float32)    # (TILE_T, 2*nfp) f32
    re = re_im[:, :n_freqs_pad]
    im = re_im[:, n_freqs_pad:]
    power = re * re + im * im                              # power=2.0, f32 on VPU
    mel = jnp.dot(power.astype(jnp.bfloat16), mel_ref[...],
                  preferred_element_type=jnp.float32)      # (TILE_T, n_mels_pad)
    out_ref[...] = jnp.log(jnp.maximum(mel, 1e-9))         # f32 clamp/log


def _logmel_pallas(frames, dft_b, mel_fb, *, n_freqs_pad, tile_t):
    T_pad, n_fft_pad = frames.shape
    two_nf = dft_b.shape[1]
    n_mels_pad = mel_fb.shape[1]
    grid = (T_pad // tile_t,)

    flops = (2 * T_pad * n_fft_pad * two_nf          # fused DFT matmul
             + 2 * T_pad * n_freqs_pad * n_mels_pad  # mel matmul
             + 3 * T_pad * n_freqs_pad)              # power spectrum
    bytes_accessed = (frames.size * 2 + dft_b.size * 2 + mel_fb.size * 2
                      + T_pad * n_mels_pad * 4)
    cost = pl.CostEstimate(flops=int(flops),
                           transcendentals=int(T_pad * n_mels_pad),
                           bytes_accessed=int(bytes_accessed))

    kernel = functools.partial(_logmel_kernel, n_freqs_pad=n_freqs_pad)
    return pl.pallas_call(
        kernel,
        out_shape=jax.ShapeDtypeStruct((T_pad, n_mels_pad), jnp.float32),
        grid=grid,
        in_specs=[
            pl.BlockSpec((tile_t, n_fft_pad), lambda i: (i, 0)),   # frame tiles
            pl.BlockSpec((n_fft_pad, two_nf), lambda i: (0, 0)),   # fused DFT basis
            pl.BlockSpec((n_freqs_pad, n_mels_pad), lambda i: (0, 0)),  # mel fb
        ],
        out_specs=pl.BlockSpec((tile_t, n_mels_pad), lambda i: (i, 0)),
        compiler_params=pltpu.CompilerParams(
            dimension_semantics=("parallel",),          # v7x: shard tiles over TCs
            vmem_limit_bytes=32 * 1024 * 1024),
        cost_estimate=cost,
    )(frames, dft_b, mel_fb)


# --------------------------------- Wav2Mel ----------------------------------

class Wav2Mel:
    def __init__(self, sample_rate: int = 16000, norm_db: float = -3.0,
                 sil_threshold: float = 1.0, sil_duration: float = 0.1,
                 fft_window_ms: float = 25.0, fft_hop_ms: float = 10.0,
                 f_min: float = 50.0, n_mels: int = 40):
        self.sample_rate = sample_rate
        self.norm_db = norm_db
        self.hop_length = int(sample_rate * fft_hop_ms / 1000)
        self.n_fft = int(sample_rate * fft_window_ms / 1000)
        self.n_freqs = self.n_fft // 2 + 1
        self.n_mels = n_mels

        # lane/MXU-friendly padded dims
        self.n_fft_pad = _round_up(self.n_fft, 128)        # 400 -> 512
        self.n_freqs_pad = _round_up(self.n_freqs, 128)    # 201 -> 256
        self.n_mels_pad = _round_up(self.n_mels, 128)      # 40  -> 128

        window = _hann_window(self.n_fft)
        cos_b, sin_b = _dft_bases(self.n_fft, self.n_freqs, window)

        # Fused, zero-padded DFT basis: (n_fft_pad, 2*n_freqs_pad), bf16.
        dft = np.zeros((self.n_fft_pad, 2 * self.n_freqs_pad), dtype=np.float32)
        dft[:self.n_fft, :self.n_freqs] = cos_b
        dft[:self.n_fft, self.n_freqs_pad:self.n_freqs_pad + self.n_freqs] = sin_b
        self.dft_b = jnp.asarray(dft, dtype=jnp.bfloat16)

        fb = _mel_fbanks(self.n_freqs, f_min, sample_rate / 2.0, n_mels,
                         sample_rate)
        fb_pad = np.zeros((self.n_freqs_pad, self.n_mels_pad), dtype=np.float32)
        fb_pad[:self.n_freqs, :self.n_mels] = fb
        self.mel_fb = jnp.asarray(fb_pad, dtype=jnp.bfloat16)

    def _sox_effects(self, wav):
        # channels -> 1 : average channels
        if wav.ndim == 2:
            wav = jnp.mean(wav, axis=0)
        # norm to norm_db : peak normalization
        peak = jnp.max(jnp.abs(wav))
        target = 10.0 ** (self.norm_db / 20.0)
        wav = wav * (target / jnp.maximum(peak, 1e-12))
        # TODO(synk): sox 'rate' and 'silence' effects are not implemented.
        return wav

    def __call__(self, wav, sample_rate=None):
        wav = self._sox_effects(jnp.asarray(wav, jnp.float32))

        # torch.stft(center=True, pad_mode='reflect') framing
        pad = self.n_fft // 2
        padded = jnp.pad(wav, (pad, pad), mode="reflect")
        n_frames = 1 + wav.shape[0] // self.hop_length
        idx = (jnp.arange(n_frames)[:, None] * self.hop_length
               + jnp.arange(self.n_fft)[None, :])
        frames = padded[idx].astype(jnp.float32)             # (T, n_fft)

        # Pad rows to a multiple of the frame tile and cols to n_fft_pad.
        tile_t = min(256, _round_up(n_frames, 8))
        t_pad = _round_up(n_frames, tile_t)
        frames = jnp.pad(frames, ((0, t_pad - n_frames),
                                  (0, self.n_fft_pad - self.n_fft)))
        frames = frames.astype(jnp.bfloat16)

        # hot path in Pallas: fused DFT matmul + power + mel matmul + clamp/log
        mel = _logmel_pallas(frames, self.dft_b, self.mel_fb,
                             n_freqs_pad=self.n_freqs_pad, tile_t=tile_t)
        # drop row/col padding (padded mel columns/rows hold log(1e-9))
        return mel[:n_frames, :self.n_mels]


# ----------------------------------- main ------------------------------------

if __name__ == "__main__":
    key = jax.random.PRNGKey(0)
    sample_rate = 16000
    # 0.25 s stereo waveform -> 26 frames x 40 mels
    wav = 0.1 * jax.random.normal(key, (2, 4000), dtype=jnp.float32)

    wav2mel = Wav2Mel(sample_rate=sample_rate)
    mel = wav2mel(wav, sample_rate)
    mel = jax.block_until_ready(mel)

    assert mel.shape == (1 + 4000 // wav2mel.hop_length, wav2mel.n_mels)
    assert mel.dtype == jnp.float32
    assert bool(jnp.all(jnp.isfinite(mel)))
    print("KERNEL_OK")
</pallas_src>

<mosaic_0001>
module attributes {stable_mosaic.version = 11 : i64} {
  func.func @_logmel_kernel(%arg0: i32, %arg1: memref<32x512xbf16, #tpu.memory_space<vmem>>, %arg2: memref<512x512xbf16, #tpu.memory_space<vmem>>, %arg3: memref<256x128xbf16, #tpu.memory_space<vmem>>, %arg4: memref<32x128xf32, #tpu.memory_space<vmem>>) attributes {dimension_semantics = [#tpu.dimension_semantics<parallel>], iteration_bounds = array<i64: 1>, scalar_prefetch = 0 : i64, scratch_operands = 0 : i64, tpu.core_type = #tpu.core_type<tc>, window_params = [{transform_indices = @transform_0, window_bounds = array<i64: 32, 512>}, {pipeline_mode = #tpu.pipeline_mode<synchronous>, transform_indices = @transform_1, window_bounds = array<i64: 512, 512>}, {pipeline_mode = #tpu.pipeline_mode<synchronous>, transform_indices = @transform_2, window_bounds = array<i64: 256, 128>}, {transform_indices = @transform_3, window_bounds = array<i64: 32, 128>}]} {
    %c0 = arith.constant 0 : index
    %c0_0 = arith.constant 0 : index
    %0 = vector.load %arg1[%c0, %c0_0] : memref<32x512xbf16, #tpu.memory_space<vmem>>, vector<32x512xbf16>
    %c0_1 = arith.constant 0 : index
    %c0_2 = arith.constant 0 : index
    %1 = vector.load %arg2[%c0_1, %c0_2] : memref<512x512xbf16, #tpu.memory_space<vmem>>, vector<512x512xbf16>
    %cst = arith.constant dense<0.000000e+00> : vector<32x512xf32>
    %2 = tpu.matmul %0, %1, %cst {dimension_numbers = #tpu.dot_dimension_numbers<[1], [0], [0], [1], [0, 0, 1, 1], [], []>} : vector<32x512xbf16>, vector<512x512xbf16>, vector<32x512xf32> -> vector<32x512xf32>
    %3 = vector.extract_strided_slice %2 {offsets = [0, 0], sizes = [32, 256], strides = [1, 1]} : vector<32x512xf32> to vector<32x256xf32>
    %4 = vector.extract_strided_slice %2 {offsets = [0, 256], sizes = [32, 256], strides = [1, 1]} : vector<32x512xf32> to vector<32x256xf32>
    %5 = arith.mulf %3, %3 : vector<32x256xf32>
    %6 = arith.mulf %4, %4 : vector<32x256xf32>
    %7 = arith.addf %5, %6 : vector<32x256xf32>
    %8 = arith.truncf %7 : vector<32x256xf32> to vector<32x256xbf16>
    %c0_3 = arith.constant 0 : index
    %c0_4 = arith.constant 0 : index
    %9 = vector.load %arg3[%c0_3, %c0_4] : memref<256x128xbf16, #tpu.memory_space<vmem>>, vector<256x128xbf16>
    %cst_5 = arith.constant dense<0.000000e+00> : vector<32x128xf32>
    %10 = tpu.matmul %8, %9, %cst_5 {dimension_numbers = #tpu.dot_dimension_numbers<[1], [0], [0], [1], [0, 0, 1, 1], [], []>} : vector<32x256xbf16>, vector<256x128xbf16>, vector<32x128xf32> -> vector<32x128xf32>
    %cst_6 = arith.constant 9.99999971E-10 : f32
    %11 = vector.broadcast %cst_6 : f32 to vector<32x128xf32>
    %12 = arith.maximumf %10, %11 : vector<32x128xf32>
    %13 = math.log %12 : vector<32x128xf32>
    %c0_7 = arith.constant 0 : index
    %c0_8 = arith.constant 0 : index
    %14 = vector.load %arg4[%c0_7, %c0_8] : memref<32x128xf32, #tpu.memory_space<vmem>>, vector<32x128xf32>
    tpu.vector_store %arg4[%c0_7, %c0_8], %13 {strides = array<i32>} : memref<32x128xf32, #tpu.memory_space<vmem>>, vector<32x128xf32>,
    return
  }
  func.func @transform_0(%arg0: i32) -> (i32, i32) {
    %c0_i32 = arith.constant 0 : i32
    %c0_i32_0 = arith.constant 0 : i32
    return %arg0, %c0_i32 : i32, i32
  }
  func.func @transform_1(%arg0: i32) -> (i32, i32) {
    %c0_i32 = arith.constant 0 : i32
    %c0_i32_0 = arith.constant 0 : i32
    %c0_i32_1 = arith.constant 0 : i32
    return %c0_i32, %c0_i32_0 : i32, i32
  }
  func.func @transform_2(%arg0: i32) -> (i32, i32) {
    %c0_i32 = arith.constant 0 : i32
    %c0_i32_0 = arith.constant 0 : i32
    %c0_i32_1 = arith.constant 0 : i32
    return %c0_i32, %c0_i32_0 : i32, i32
  }
  func.func @transform_3(%arg0: i32) -> (i32, i32) {
    %c0_i32 = arith.constant 0 : i32
    %c0_i32_0 = arith.constant 0 : i32
    return %arg0, %c0_i32 : i32, i32
  }
}

</mosaic_0001>

<bundles_post_ra>
// kernel: tpu_custom_call.1
= control target key start
LH: loop header
LB: loop body
LE: loop exit
PB: predicated region body
PF: predicated region fallthrough
CT: control target
= control target key end

     0   :  { %8 = vsyncpa [#allocation3], 0  ;;  %s1918_s0 = inlined_call_operand.hbm [shape: bf16[32,512], index: 0, kind: input, shape index: {}]   ;;  %s1919_s1 = inlined_call_operand.hbm [shape: bf16[512,512], index: 1, kind: input, shape index: {}]   ;;  %s1920_s2 = inlined_call_operand.hbm [shape: bf16[256,128], index: 2, kind: input, shape index: {}]   ;;  %s1921_s3 = inlined_call_operand.hbm [shape: f32[32,128], index: 3, kind: output, shape index: {}]  }
   0x1   :  { %9 = vsyncpa [#allocation6], 0 }
   0x2   :  { %10 = vsyncpa [#allocation4], 0  ;;  %s1844_s12 = smov [#allocation5]   ;;  %s1845_s14 = smov [#allocation2]  }
   0x3   :  { %s28_s13 = sshll.u32 %s1844_s12, 4  ;;  %s16_s15 = sshll.u32 %s1845_s14, 4  ;;  %s29_s13 = int_to_ptr.vmem [resolvable:$true] %s28_s13  ;;  %s17_s15 = int_to_ptr.vmem [resolvable:$true] %s16_s15 }
   0x4   :  { %s1766_s16 = scalar_lea.vmem %s29_s13, 16384  ;;  %p1771_p1 = scmp.lt.s32.totalorder %s29_s13, %s29_s13 }
   0x5   :  { %p1767_p0 = scmp.ne.s32.totalorder %s29_s13, %s1766_s16  ;;  %p1772_p2 = scmp.lt.s32.totalorder %s1766_s16, %s1766_s16 }
   0x7   :  { %p1773_p3 = por %p1772_p2, %p1771_p1 }
   0x9   :  { %p1774_p4 = pnand %p1773_p3, %p1767_p0 }
   0xb   :  { %1777 = shalt.err (!%p1774_p4)
}
   0xc   :  { %s1846_s17 = smov 256   ;;  %s1847_s18 = smov 16  }
   0xd   :  { %34 = dma.hbm_to_vmem [thread:$0]  %s1919_s1, 16384, %s29_s13, [#allocation6], %s1846_s17, %s1846_s17, %s1847_s18  }
   0xe   :  { %s1786_s21 = scalar_lea.vmem %s17_s15, 1024  ;;  %p1791_p6 = scmp.lt.s32.totalorder %s17_s15, %s17_s15 }
   0xf   :  { %p1787_p5 = scmp.ne.s32.totalorder %s17_s15, %s1786_s21  ;;  %p1792_p7 = scmp.lt.s32.totalorder %s1786_s21, %s1786_s21 }
  0x11   :  { %p1793_p8 = por %p1792_p7, %p1791_p6 }
  0x13   :  { %p1794_p9 = pnand %p1793_p8, %p1787_p5 }
  0x15   :  { %1797 = shalt.err (!%p1794_p9)
}
  0x16   :  { %22 = dma.hbm_to_vmem [thread:$0]  %s1918_s0, 1024, %s17_s15, [#allocation3], %s1846_s17, %s1846_s17, %s1847_s18  }
  0x17   :  { %s1848_s24 = smov [#allocation7]  }
  0x18   :  { %s40_s25 = sshll.u32 %s1848_s24, 4  ;;  %s41_s25 = int_to_ptr.vmem [resolvable:$true] %s40_s25 }
  0x19   :  { %s1806_s26 = scalar_lea.vmem %s41_s25, 2048  ;;  %p1811_p11 = scmp.lt.s32.totalorder %s41_s25, %s41_s25 }
  0x1a   :  { %p1807_p10 = scmp.ne.s32.totalorder %s41_s25, %s1806_s26  ;;  %p1812_p12 = scmp.lt.s32.totalorder %s1806_s26, %s1806_s26 }
  0x1c   :  { %p1813_p13 = por %p1812_p12, %p1811_p11 }
  0x1e   :  { %p1814_p0 = pnand %p1813_p13, %p1807_p10 }
  0x20   :  { %1817 = shalt.err (!%p1814_p0)
}
  0x21   :  { %s1849_s1 = smov 64   ;;  %s1850_s27 = smov 4  }
  0x22   :  { %46 = dma.hbm_to_vmem [thread:$0]  %s1920_s2, 2048, %s41_s25, [#allocation6], %s1849_s1, %s1849_s1, %s1850_s27  }
  0x23   :  { %1838 = dma.done.wait [#allocation3], 1024  }
  0x24   :  { %1839 = vsyncadd [#allocation3], 4294966272 }
  0x25   :  { %1840 = dma.done.wait [#allocation6], 18432  }
  0x26   :  { %1841 = vsyncadd [#allocation6], 4294948864  ;;  %v1530_v0 = vld [vmem:[#allocation5 + $0xe4] ss:$16 sps:$4 sm:$0xff]   ;;  %v1534_v2 = vld [vmem:[#allocation5 + $0xe0] ss:$16 sps:$4 sm:$0xff]  }
  0x27   :  { %v1532_v1 = vld [vmem:[#allocation5 + $0x2e4] ss:$16 sps:$4 sm:$0xff]   ;;  %873 = vmatprep.subr.bf16.mxu0 %v1530_v0  ;;  %v1535_v3 = vld [vmem:[#allocation5 + $0x2e0] ss:$16 sps:$4 sm:$0xff]   ;;  %v1885_v51 = vld [vmem:[#allocation2 + $0xc] ss:$16 sps:$4 sm:$0xff]  }
  0x28   :  { %926 = vmatprep.subr.bf16.mxu1 %v1532_v1  ;;  %v1536_v4 = vld [vmem:[#allocation5 + $0xc4] ss:$16 sps:$4 sm:$0xff]   ;;  %874 = vmatpush1.bf16.msra.mxu0 %v1534_v2  ;;  %v1540_v6 = vld [vmem:[#allocation5 + $0xc0] ss:$16 sps:$4 sm:$0xff]   ;;  %v1634_v2 = vld [vmem:[#allocation5 + $0xec] ss:$16 sps:$4 sm:$0xff]  }
  0x29   :  { %927 = vmatpush1.bf16.msra.mxu1 %v1535_v3  ;;  %v1538_v5 = vld [vmem:[#allocation5 + $0x2c4] ss:$16 sps:$4 sm:$0xff]   ;;  %875 = vmatprep.subr.bf16.mxu0 %v1536_v4  ;;  %v1541_v7 = vld [vmem:[#allocation5 + $0x2c0] ss:$16 sps:$4 sm:$0xff]   ;;  %v1637_v3 = vld [vmem:[#allocation5 + $0x2ec] ss:$16 sps:$4 sm:$0xff]  }
  0x2a   :  { %928 = vmatprep.subr.bf16.mxu1 %v1538_v5  ;;  %v1542_v8 = vld [vmem:[#allocation5 + $0xa4] ss:$16 sps:$4 sm:$0xff]   ;;  %v1546_v10 = vld [vmem:[#allocation5 + $0xa0] ss:$16 sps:$4 sm:$0xff]   ;;  %958 = vmatprep.mubr.bf16.mxu1 %v1885_v51  ;;  %v1891_v5 = vld [vmem:[#allocation2 + $0x8] ss:$16 sps:$4 sm:$0xff]  }
  0x2b   :  { %v1544_v9 = vld [vmem:[#allocation5 + $0x2a4] ss:$16 sps:$4 sm:$0xff]   ;;  %v1547_v11 = vld [vmem:[#allocation5 + $0x2a0] ss:$16 sps:$4 sm:$0xff]   ;;  %s1851_s0 = smov [#allocation8]  }
  0x2c   :  { %876 = vmatpush1.bf16.msra.mxu0 %v1540_v6  ;;  %v1548_v12 = vld [vmem:[#allocation5 + $0x84] ss:$16 sps:$4 sm:$0xff]   ;;  %v1552_v14 = vld [vmem:[#allocation5 + $0x80] ss:$16 sps:$4 sm:$0xff]   ;;  %v1632_v6 = vld [vmem:[#allocation5 + $0xe8] ss:$16 sps:$4 sm:$0xff]  }
  0x2d   :  { %929 = vmatpush1.bf16.msra.mxu1 %v1541_v7  ;;  %877 = vmatprep.subr.bf16.mxu0 %v1542_v8  ;;  %v1550_v13 = vld [vmem:[#allocation5 + $0x284] ss:$16 sps:$4 sm:$0xff]   ;;  %v1553_v15 = vld [vmem:[#allocation5 + $0x280] ss:$16 sps:$4 sm:$0xff]   ;;  %v1635_v7 = vld [vmem:[#allocation5 + $0x2e8] ss:$16 sps:$4 sm:$0xff]  }
  0x2e   :  { %930 = vmatprep.subr.bf16.mxu1 %v1544_v9  ;;  %v1554_v16 = vld [vmem:[#allocation5 + $0x64] ss:$16 sps:$4 sm:$0xff]   ;;  %v1558_v18 = vld [vmem:[#allocation5 + $0x60] ss:$16 sps:$4 sm:$0xff]   ;;  %v1640_v8 = vld [vmem:[#allocation5 + $0xcc] ss:$16 sps:$4 sm:$0xff]  }
  0x2f   :  { %v1556_v17 = vld [vmem:[#allocation5 + $0x264] ss:$16 sps:$4 sm:$0xff]   ;;  %v1559_v19 = vld [vmem:[#allocation5 + $0x260] ss:$16 sps:$4 sm:$0xff]   ;;  %v1643_v9 = vld [vmem:[#allocation5 + $0x2cc] ss:$16 sps:$4 sm:$0xff]  }
  0x30   :  { %878 = vmatpush1.bf16.msra.mxu0 %v1546_v10  ;;  %v1560_v20 = vld [vmem:[#allocation5 + $0x44] ss:$16 sps:$4 sm:$0xff]   ;;  %v1564_v22 = vld [vmem:[#allocation5 + $0x40] ss:$16 sps:$4 sm:$0xff]   ;;  %v1638_v10 = vld [vmem:[#allocation5 + $0xc8] ss:$16 sps:$4 sm:$0xff]  }
  0x31   :  { %931 = vmatpush1.bf16.msra.mxu1 %v1547_v11  ;;  %879 = vmatprep.subr.bf16.mxu0 %v1548_v12  ;;  %v1562_v21 = vld [vmem:[#allocation5 + $0x244] ss:$16 sps:$4 sm:$0xff]   ;;  %v1565_v23 = vld [vmem:[#allocation5 + $0x240] ss:$16 sps:$4 sm:$0xff]   ;;  %v1641_v11 = vld [vmem:[#allocation5 + $0x2c8] ss:$16 sps:$4 sm:$0xff]  }
  0x32   :  { %932 = vmatprep.subr.bf16.mxu1 %v1550_v13  ;;  %v1566_v24 = vld [vmem:[#allocation5 + $0x24] ss:$16 sps:$4 sm:$0xff]   ;;  %v1570_v26 = vld [vmem:[#allocation5 + $0x20] ss:$16 sps:$4 sm:$0xff]   ;;  %v1646_v12 = vld [vmem:[#allocation5 + $0xac] ss:$16 sps:$4 sm:$0xff]  }
  0x33   :  { %v1568_v25 = vld [vmem:[#allocation5 + $0x224] ss:$16 sps:$4 sm:$0xff]   ;;  %v1571_v27 = vld [vmem:[#allocation5 + $0x220] ss:$16 sps:$4 sm:$0xff]   ;;  %v1649_v13 = vld [vmem:[#allocation5 + $0x2ac] ss:$16 sps:$4 sm:$0xff]  }
  0x34   :  { %880 = vmatpush1.bf16.msra.mxu0 %v1552_v14  ;;  %v1572_v28 = vld [vmem:[#allocation5 + $0x4] ss:$16 sps:$4 sm:$0xff]   ;;  %v1576_v30 = vld [vmem:[#allocation5] ss:$16 sps:$4 sm:$0xff]   ;;  %v1644_v14 = vld [vmem:[#allocation5 + $0xa8] ss:$16 sps:$4 sm:$0xff]  }
  0x35   :  { %933 = vmatpush1.bf16.msra.mxu1 %v1553_v15  ;;  %881 = vmatprep.subr.bf16.mxu0 %v1554_v16  ;;  %v1574_v29 = vld [vmem:[#allocation5 + $0x204] ss:$16 sps:$4 sm:$0xff]   ;;  %v1577_v31 = vld [vmem:[#allocation5 + $0x200] ss:$16 sps:$4 sm:$0xff]   ;;  %v1647_v15 = vld [vmem:[#allocation5 + $0x2a8] ss:$16 sps:$4 sm:$0xff]  }
  0x36   :  { %934 = vmatprep.subr.bf16.mxu1 %v1556_v17  ;;  %v1578_v32 = vld [vmem:[#allocation5 + $0x1e4] ss:$16 sps:$4 sm:$0xff]   ;;  %v1582_v34 = vld [vmem:[#allocation5 + $0x1e0] ss:$16 sps:$4 sm:$0xff]   ;;  %v1652_v16 = vld [vmem:[#allocation5 + $0x8c] ss:$16 sps:$4 sm:$0xff]  }
  0x37   :  { %v1580_v33 = vld [vmem:[#allocation5 + $0x3e4] ss:$16 sps:$4 sm:$0xff]   ;;  %v1583_v35 = vld [vmem:[#allocation5 + $0x3e0] ss:$16 sps:$4 sm:$0xff]   ;;  %v1655_v17 = vld [vmem:[#allocation5 + $0x28c] ss:$16 sps:$4 sm:$0xff]  }
  0x38   :  { %882 = vmatpush1.bf16.msra.mxu0 %v1558_v18  ;;  %v1584_v36 = vld [vmem:[#allocation5 + $0x1c4] ss:$16 sps:$4 sm:$0xff]   ;;  %v1588_v38 = vld [vmem:[#allocation5 + $0x1c0] ss:$16 sps:$4 sm:$0xff]   ;;  %v1650_v18 = vld [vmem:[#allocation5 + $0x88] ss:$16 sps:$4 sm:$0xff]  }
  0x39   :  { %935 = vmatpush1.bf16.msra.mxu1 %v1559_v19  ;;  %883 = vmatprep.subr.bf16.mxu0 %v1560_v20  ;;  %v1586_v37 = vld [vmem:[#allocation5 + $0x3c4] ss:$16 sps:$4 sm:$0xff]   ;;  %v1589_v39 = vld [vmem:[#allocation5 + $0x3c0] ss:$16 sps:$4 sm:$0xff]   ;;  %v1653_v19 = vld [vmem:[#allocation5 + $0x288] ss:$16 sps:$4 sm:$0xff]  }
  0x3a   :  { %936 = vmatprep.subr.bf16.mxu1 %v1562_v21  ;;  %v1590_v40 = vld [vmem:[#allocation5 + $0x1a4] ss:$16 sps:$4 sm:$0xff]   ;;  %v1594_v42 = vld [vmem:[#allocation5 + $0x1a0] ss:$16 sps:$4 sm:$0xff]   ;;  %v1658_v20 = vld [vmem:[#allocation5 + $0x6c] ss:$16 sps:$4 sm:$0xff]  }
  0x3b   :  { %v1592_v41 = vld [vmem:[#allocation5 + $0x3a4] ss:$16 sps:$4 sm:$0xff]   ;;  %v1595_v43 = vld [vmem:[#allocation5 + $0x3a0] ss:$16 sps:$4 sm:$0xff]   ;;  %v1661_v21 = vld [vmem:[#allocation5 + $0x26c] ss:$16 sps:$4 sm:$0xff]  }
  0x3c   :  { %884 = vmatpush1.bf16.msra.mxu0 %v1564_v22  ;;  %v1596_v44 = vld [vmem:[#allocation5 + $0x184] ss:$16 sps:$4 sm:$0xff]   ;;  %v1600_v46 = vld [vmem:[#allocation5 + $0x180] ss:$16 sps:$4 sm:$0xff]   ;;  %v1656_v22 = vld [vmem:[#allocation5 + $0x68] ss:$16 sps:$4 sm:$0xff]  }
  0x3d   :  { %937 = vmatpush1.bf16.msra.mxu1 %v1565_v23  ;;  %885 = vmatprep.subr.bf16.mxu0 %v1566_v24  ;;  %v1598_v45 = vld [vmem:[#allocation5 + $0x384] ss:$16 sps:$4 sm:$0xff]   ;;  %v1601_v47 = vld [vmem:[#allocation5 + $0x380] ss:$16 sps:$4 sm:$0xff]   ;;  %v1659_v23 = vld [vmem:[#allocation5 + $0x268] ss:$16 sps:$4 sm:$0xff]  }
  0x3e   :  { %938 = vmatprep.subr.bf16.mxu1 %v1568_v25  ;;  %v1602_v48 = vld [vmem:[#allocation5 + $0x164] ss:$16 sps:$4 sm:$0xff]   ;;  %v1606_v52 = vld [vmem:[#allocation5 + $0x160] ss:$16 sps:$4 sm:$0xff]   ;;  %v1664_v24 = vld [vmem:[#allocation5 + $0x4c] ss:$16 sps:$4 sm:$0xff]  }
  0x3f   :  { %v1883_v49 = vld [vmem:[#allocation2 + $0x4] ss:$16 sps:$4 sm:$0xff]   ;;  %v1607_v53 = vld [vmem:[#allocation5 + $0x360] ss:$16 sps:$4 sm:$0xff]   ;;  %v1667_v25 = vld [vmem:[#allocation5 + $0x24c] ss:$16 sps:$4 sm:$0xff]  }
  0x40   :  { %886 = vmatpush1.bf16.msra.mxu0 %v1570_v26  ;;  %v1604_v50 = vld [vmem:[#allocation5 + $0x364] ss:$16 sps:$4 sm:$0xff]   ;;  %905 = vmatprep.mubr.bf16.mxu0 %v1883_v49  ;;  %v1612_v56 = vld [vmem:[#allocation5 + $0x140] ss:$16 sps:$4 sm:$0xff]   ;;  %s1311_s2 = sshll.u32 %s1851_s0, 4  ;;  %s1312_s2 = int_to_ptr.vmem [resolvable:$true] %s1311_s2 }
  0x41   :  { %939 = vmatpush1.bf16.msra.mxu1 %v1571_v27  ;;  %887 = vmatprep.subr.bf16.mxu0 %v1572_v28  ;;  %v1608_v54 = vld [vmem:[#allocation5 + $0x144] ss:$16 sps:$4 sm:$0xff]   ;;  %v1613_v57 = vld [vmem:[#allocation5 + $0x340] ss:$16 sps:$4 sm:$0xff]   ;;  %v1897_v27 = vld [vmem:[#allocation2 + $0x2c] ss:$16 sps:$4 sm:$0xff]   ;;  %p1823_p2 = scmp.lt.s32.totalorder %s1312_s2, %s1312_s2 }
  0x42   :  { %940 = vmatprep.subr.bf16.mxu1 %v1574_v29  ;;  %v1610_v55 = vld [vmem:[#allocation5 + $0x344] ss:$16 sps:$4 sm:$0xff]   ;;  %v1618_v60 = vld [vmem:[#allocation5 + $0x120] ss:$16 sps:$4 sm:$0xff]   ;;  %v1902_v29 = vld [vmem:[#allocation2 + $0x28] ss:$16 sps:$4 sm:$0xff]  }
  0x43   :  { %v1614_v58 = vld [vmem:[#allocation5 + $0x124] ss:$16 sps:$4 sm:$0xff]   ;;  %v1619_v61 = vld [vmem:[#allocation5 + $0x320] ss:$16 sps:$4 sm:$0xff]   ;;  %s1818_s30 = scalar_lea.vmem %s1312_s2, 512 }
  0x44   :  { %888 = vmatpush1.bf16.msra.mxu0 %v1576_v30  ;;  %v1616_v59 = vld [vmem:[#allocation5 + $0x324] ss:$16 sps:$4 sm:$0xff]   ;;  %v1624_v0 = vld [vmem:[#allocation5 + $0x100] ss:$16 sps:$4 sm:$0xff]   ;;  %v1662_v30 = vld [vmem:[#allocation5 + $0x48] ss:$16 sps:$4 sm:$0xff]   ;;  %p1819_p1 = scmp.ne.s32.totalorder %s1312_s2, %s1818_s30  ;;  %p1824_p3 = scmp.lt.s32.totalorder %s1818_s30, %s1818_s30 }
  0x45   :  { %941 = vmatpush1.bf16.msra.mxu1 %v1577_v31  ;;  %889 = vmatprep.subr.bf16.mxu0 %v1578_v32  ;;  %v1620_v62 = vld [vmem:[#allocation5 + $0x104] ss:$16 sps:$4 sm:$0xff]   ;;  %v1625_v1 = vld [vmem:[#allocation5 + $0x300] ss:$16 sps:$4 sm:$0xff]   ;;  %v1665_v31 = vld [vmem:[#allocation5 + $0x248] ss:$16 sps:$4 sm:$0xff]  }
  0x46   :  { %942 = vmatprep.subr.bf16.mxu1 %v1580_v33  ;;  %v1622_v63 = vld [vmem:[#allocation5 + $0x304] ss:$16 sps:$4 sm:$0xff]   ;;  %v1889_v4 = vld [vmem:[#allocation2] ss:$16 sps:$4 sm:$0xff]   ;;  %v1670_v32 = vld [vmem:[#allocation5 + $0x2c] ss:$16 sps:$4 sm:$0xff]   ;;  %p1825_p4 = por %p1824_p3, %p1823_p2 }
  0x47   :  { %v1895_v26 = vld [vmem:[#allocation2 + $0x24] ss:$16 sps:$4 sm:$0xff]   ;;  %v1900_v28 = vld [vmem:[#allocation2 + $0x20] ss:$16 sps:$4 sm:$0xff]   ;;  %v1673_v33 = vld [vmem:[#allocation5 + $0x22c] ss:$16 sps:$4 sm:$0xff]  }
  0x48   :  { %890 = vmatpush2.bf16.msra.mxu0 %v1582_v34  ;;  %v1668_v34 = vld [vmem:[#allocation5 + $0x28] ss:$16 sps:$4 sm:$0xff]   ;;  %p1826_p5 = pnand %p1825_p4, %p1819_p1 }
  0x49   :  { %943 = vmatpush2.bf16.msra.mxu1 %v1583_v35  ;;  %891 = vmatprep.subr.bf16.mxu0 %v1584_v36  ;;  %v1671_v35 = vld [vmem:[#allocation5 + $0x228] ss:$16 sps:$4 sm:$0xff]   ;;  %v1676_v36 = vld [vmem:[#allocation5 + $0xc] ss:$16 sps:$4 sm:$0xff]  }
  0x4a   :  { %944 = vmatprep.subr.bf16.mxu1 %v1586_v37  ;;  %v1679_v37 = vld [vmem:[#allocation5 + $0x20c] ss:$16 sps:$4 sm:$0xff]  }
  0x4c   :  { %892 = vmatpush2.bf16.msra.mxu0 %v1588_v38  ;;  %v1674_v38 = vld [vmem:[#allocation5 + $0x8] ss:$16 sps:$4 sm:$0xff]  }
  0x4d   :  { %945 = vmatpush2.bf16.msra.mxu1 %v1589_v39  ;;  %893 = vmatprep.subr.bf16.mxu0 %v1590_v40  ;;  %v1677_v39 = vld [vmem:[#allocation5 + $0x208] ss:$16 sps:$4 sm:$0xff]   ;;  %v1682_v40 = vld [vmem:[#allocation5 + $0x1ec] ss:$16 sps:$4 sm:$0xff]  }
  0x4e   :  { %946 = vmatprep.subr.bf16.mxu1 %v1592_v41  ;;  %v1685_v41 = vld [vmem:[#allocation5 + $0x3ec] ss:$16 sps:$4 sm:$0xff]  }
  0x50   :  { %894 = vmatpush2.bf16.msra.mxu0 %v1594_v42  ;;  %v1680_v42 = vld [vmem:[#allocation5 + $0x1e8] ss:$16 sps:$4 sm:$0xff]  }
  0x51   :  { %947 = vmatpush2.bf16.msra.mxu1 %v1595_v43  ;;  %895 = vmatprep.subr.bf16.mxu0 %v1596_v44  ;;  %v1683_v43 = vld [vmem:[#allocation5 + $0x3e8] ss:$16 sps:$4 sm:$0xff]   ;;  %v1688_v44 = vld [vmem:[#allocation5 + $0x1cc] ss:$16 sps:$4 sm:$0xff]  }
  0x52   :  { %948 = vmatprep.subr.bf16.mxu1 %v1598_v45  ;;  %v1691_v45 = vld [vmem:[#allocation5 + $0x3cc] ss:$16 sps:$4 sm:$0xff]  }
  0x54   :  { %896 = vmatpush2.bf16.msra.mxu0 %v1600_v46  ;;  %v1686_v46 = vld [vmem:[#allocation5 + $0x1c8] ss:$16 sps:$4 sm:$0xff]  }
  0x55   :  { %949 = vmatpush2.bf16.msra.mxu1 %v1601_v47  ;;  %897 = vmatprep.subr.bf16.mxu0 %v1602_v48  ;;  %v1689_v47 = vld [vmem:[#allocation5 + $0x3c8] ss:$16 sps:$4 sm:$0xff]   ;;  %v1694_v48 = vld [vmem:[#allocation5 + $0x1ac] ss:$16 sps:$4 sm:$0xff]  }
  0x56   :  { %950 = vmatprep.subr.bf16.mxu1 %v1604_v50  ;;  %v1692_v50 = vld [vmem:[#allocation5 + $0x1a8] ss:$16 sps:$4 sm:$0xff]  }
  0x58   :  { %898 = vmatpush2.bf16.msra.mxu0 %v1606_v52  ;;  %v1700_v52 = vld [vmem:[#allocation5 + $0x18c] ss:$16 sps:$4 sm:$0xff]  }
  0x59   :  { %951 = vmatpush2.bf16.msra.mxu1 %v1607_v53  ;;  %899 = vmatprep.subr.bf16.mxu0 %v1608_v54  ;;  %v1703_v53 = vld [vmem:[#allocation5 + $0x38c] ss:$16 sps:$4 sm:$0xff]   ;;  %v1698_v54 = vld [vmem:[#allocation5 + $0x188] ss:$16 sps:$4 sm:$0xff]  }
  0x5a   :  { %952 = vmatprep.subr.bf16.mxu1 %v1610_v55  ;;  %v1701_v55 = vld [vmem:[#allocation5 + $0x388] ss:$16 sps:$4 sm:$0xff]  }
  0x5c   :  { %900 = vmatpush2.bf16.msra.mxu0 %v1612_v56  ;;  %v1706_v56 = vld [vmem:[#allocation5 + $0x16c] ss:$16 sps:$4 sm:$0xff]  }
  0x5d   :  { %953 = vmatpush2.bf16.msra.mxu1 %v1613_v57  ;;  %901 = vmatprep.subr.bf16.mxu0 %v1614_v58  ;;  %v1709_v57 = vld [vmem:[#allocation5 + $0x36c] ss:$16 sps:$4 sm:$0xff]   ;;  %v1704_v58 = vld [vmem:[#allocation5 + $0x168] ss:$16 sps:$4 sm:$0xff]  }
  0x5e   :  { %954 = vmatprep.subr.bf16.mxu1 %v1616_v59  ;;  %v1707_v59 = vld [vmem:[#allocation5 + $0x368] ss:$16 sps:$4 sm:$0xff]  }
  0x60   :  { %902 = vmatpush2.bf16.msra.mxu0 %v1618_v60  ;;  %v1718_v60 = vld [vmem:[#allocation5 + $0x14c] ss:$16 sps:$4 sm:$0xff]  }
  0x61   :  { %955 = vmatpush2.bf16.msra.mxu1 %v1619_v61  ;;  %903 = vmatprep.subr.bf16.mxu0 %v1620_v62  ;;  %v1721_v61 = vld [vmem:[#allocation5 + $0x34c] ss:$16 sps:$4 sm:$0xff]   ;;  %v1716_v62 = vld [vmem:[#allocation5 + $0x148] ss:$16 sps:$4 sm:$0xff]  }
  0x62   :  { %956 = vmatprep.subr.bf16.mxu1 %v1622_v63  ;;  %v1719_v63 = vld [vmem:[#allocation5 + $0x348] ss:$16 sps:$4 sm:$0xff]  }
  0x64   :  { %904 = vmatpush2.bf16.msra.mxu0 %v1624_v0  ;;  %v1724_v0 = vld [vmem:[#allocation5 + $0x12c] ss:$16 sps:$4 sm:$0xff]  }
  0x65   :  { %957 = vmatpush2.bf16.msra.mxu1 %v1625_v1  ;;  %979 = vmatprep.subr.bf16.mxu0 %v1634_v2  ;;  %v1727_v1 = vld [vmem:[#allocation5 + $0x32c] ss:$16 sps:$4 sm:$0xff]   ;;  %v1722_v2 = vld [vmem:[#allocation5 + $0x128] ss:$16 sps:$4 sm:$0xff]  }
  0x66   :  { %1032 = vmatprep.subr.bf16.mxu1 %v1637_v3  ;;  %v1725_v3 = vld [vmem:[#allocation5 + $0x328] ss:$16 sps:$4 sm:$0xff]  }
  0x67   :  { %906 = vmatmul.mubr.bf16.vlgmr.msra.gmra.mxu0 %v1889_v4 }
  0x68   :  { %959 = vmatmul.mubr.bf16.vlgmr.msra.gmra.mxu1 %v1891_v5  ;;  %980 = vmatpush1.bf16.msra.mxu0 %v1632_v6  ;;  %v1730_v6 = vld [vmem:[#allocation5 + $0x10c] ss:$16 sps:$4 sm:$0xff]  }
  0x69   :  { %1033 = vmatpush1.bf16.msra.mxu1 %v1635_v7  ;;  %981 = vmatprep.subr.bf16.mxu0 %v1640_v8  ;;  %v1733_v7 = vld [vmem:[#allocation5 + $0x30c] ss:$16 sps:$4 sm:$0xff]   ;;  %v1728_v8 = vld [vmem:[#allocation5 + $0x108] ss:$16 sps:$4 sm:$0xff]  }
  0x6a   :  { %1034 = vmatprep.subr.bf16.mxu1 %v1643_v9  ;;  %915 = vmatprep.mubr.bf16.mxu0 %v1895_v26  ;;  %v1731_v9 = vld [vmem:[#allocation5 + $0x308] ss:$16 sps:$4 sm:$0xff]  }
  0x6b   :  { %968 = vmatprep.mubr.bf16.mxu1 %v1897_v27 }
  0x6c   :  { %982 = vmatpush1.bf16.msra.mxu0 %v1638_v10  ;;  %v1734_v10 = vld [vmem:[#allocation7 + $0x78] sm:$0xff]  }
  0x6d   :  { %1035 = vmatpush1.bf16.msra.mxu1 %v1641_v11  ;;  %983 = vmatprep.subr.bf16.mxu0 %v1646_v12  ;;  %v1735_v11 = vld [vmem:[#allocation7 + $0x38] sm:$0xff]   ;;  %v1736_v12 = vld [vmem:[#allocation7 + $0x70] sm:$0xff]  }
  0x6e   :  { %1036 = vmatprep.subr.bf16.mxu1 %v1649_v13  ;;  %v1737_v13 = vld [vmem:[#allocation7 + $0x30] sm:$0xff]  }
  0x6f   :  { %916 = vmatmul.mubr.bf16.gmra.mxu0 %v1900_v28 }
  0x70   :  { %984 = vmatpush1.bf16.msra.mxu0 %v1644_v14  ;;  %969 = vmatmul.mubr.bf16.gmra.mxu1 %v1902_v29  ;;  %v1740_v14 = vld [vmem:[#allocation7 + $0x60] sm:$0xff]  }
  0x71   :  { %1037 = vmatpush1.bf16.msra.mxu1 %v1647_v15  ;;  %985 = vmatprep.subr.bf16.mxu0 %v1652_v16  ;;  %v1741_v15 = vld [vmem:[#allocation7 + $0x20] sm:$0xff]   ;;  %v1742_v16 = vld [vmem:[#allocation7 + $0x58] sm:$0xff]  }
  0x72   :  { %1038 = vmatprep.subr.bf16.mxu1 %v1655_v17  ;;  %1011 = vmatprep.mubr.bf16.mxu0 %v1883_v49  ;;  %v1697_v49 = vld [vmem:[#allocation5 + $0x3ac] ss:$16 sps:$4 sm:$0xff]  }
  0x73   :  { %1064 = vmatprep.mubr.bf16.mxu1 %v1885_v51  ;;  %v1695_v51 = vld [vmem:[#allocation5 + $0x3a8] ss:$16 sps:$4 sm:$0xff]  }
  0x74   :  { %986 = vmatpush1.bf16.msra.mxu0 %v1650_v18  ;;  %v1743_v17 = vld [vmem:[#allocation7 + $0x18] sm:$0xff]   ;;  %v1744_v18 = vld [vmem:[#allocation7 + $0x50] sm:$0xff]  }
  0x75   :  { %1039 = vmatpush1.bf16.msra.mxu1 %v1653_v19  ;;  %987 = vmatprep.subr.bf16.mxu0 %v1658_v20  ;;  %v1745_v19 = vld [vmem:[#allocation7 + $0x10] sm:$0xff]   ;;  %v1746_v20 = vld [vmem:[#allocation7 + $0x48] sm:$0xff]  }
  0x76   :  { %1040 = vmatprep.subr.bf16.mxu1 %v1661_v21  ;;  %v1747_v21 = vld [vmem:[#allocation7 + $0x8] sm:$0xff]  }
  0x78   :  { %988 = vmatpush1.bf16.msra.mxu0 %v1656_v22  ;;  %v1748_v22 = vld [vmem:[#allocation7 + $0x40] sm:$0xff]  }
  0x79   :  { %1041 = vmatpush1.bf16.msra.mxu1 %v1659_v23  ;;  %989 = vmatprep.subr.bf16.mxu0 %v1664_v24  ;;  %v1749_v23 = vld [vmem:[#allocation7] sm:$0xff]  }
  0x7a   :  { %1042 = vmatprep.subr.bf16.mxu1 %v1667_v25 }
  0x7c   :  { %990 = vmatpush1.bf16.msra.mxu0 %v1662_v30 }
  0x7d   :  { %1043 = vmatpush1.bf16.msra.mxu1 %v1665_v31  ;;  %991 = vmatprep.subr.bf16.mxu0 %v1670_v32 }
  0x7e   :  { %1044 = vmatprep.subr.bf16.mxu1 %v1673_v33 }
  0x80   :  { %992 = vmatpush1.bf16.msra.mxu0 %v1668_v34 }
  0x81   :  { %1045 = vmatpush1.bf16.msra.mxu1 %v1671_v35  ;;  %993 = vmatprep.subr.bf16.mxu0 %v1676_v36 }
  0x82   :  { %1046 = vmatprep.subr.bf16.mxu1 %v1679_v37 }
  0x84   :  { %994 = vmatpush1.bf16.msra.mxu0 %v1674_v38 }
  0x85   :  { %1047 = vmatpush1.bf16.msra.mxu1 %v1677_v39  ;;  %995 = vmatprep.subr.bf16.mxu0 %v1682_v40 }
  0x86   :  { %1048 = vmatprep.subr.bf16.mxu1 %v1685_v41 }
  0x88   :  { %996 = vmatpush2.bf16.msra.mxu0 %v1680_v42 }
  0x89   :  { %1049 = vmatpush2.bf16.msra.mxu1 %v1683_v43  ;;  %997 = vmatprep.subr.bf16.mxu0 %v1688_v44 }
  0x8a   :  { %1050 = vmatprep.subr.bf16.mxu1 %v1691_v45 }
  0x8c   :  { %998 = vmatpush2.bf16.msra.mxu0 %v1686_v46 }
  0x8d   :  { %1051 = vmatpush2.bf16.msra.mxu1 %v1689_v47  ;;  %999 = vmatprep.subr.bf16.mxu0 %v1694_v48 }
  0x8e   :  { %1052 = vmatprep.subr.bf16.mxu1 %v1697_v49 }
  0x90   :  { %1000 = vmatpush2.bf16.msra.mxu0 %v1692_v50 }
  0x91   :  { %1053 = vmatpush2.bf16.msra.mxu1 %v1695_v51  ;;  %1001 = vmatprep.subr.bf16.mxu0 %v1700_v52 }
  0x92   :  { %1054 = vmatprep.subr.bf16.mxu1 %v1703_v53 }
  0x94   :  { %1002 = vmatpush2.bf16.msra.mxu0 %v1698_v54 }
  0x95   :  { %1055 = vmatpush2.bf16.msra.mxu1 %v1701_v55  ;;  %1003 = vmatprep.subr.bf16.mxu0 %v1706_v56 }
  0x96   :  { %1056 = vmatprep.subr.bf16.mxu1 %v1709_v57 }
  0x98   :  { %1004 = vmatpush2.bf16.msra.mxu0 %v1704_v58 }
  0x99   :  { %1057 = vmatpush2.bf16.msra.mxu1 %v1707_v59  ;;  %1005 = vmatprep.subr.bf16.mxu0 %v1718_v60 }
  0x9a   :  { %1058 = vmatprep.subr.bf16.mxu1 %v1721_v61 }
  0x9c   :  { %1006 = vmatpush2.bf16.msra.mxu0 %v1716_v62 }
  0x9d   :  { %1059 = vmatpush2.bf16.msra.mxu1 %v1719_v63  ;;  %1007 = vmatprep.subr.bf16.mxu0 %v1724_v0 }
  0x9e   :  { %1060 = vmatprep.subr.bf16.mxu1 %v1727_v1 }
  0xa0   :  { %1008 = vmatpush2.bf16.msra.mxu0 %v1722_v2 }
  0xa1   :  { %1061 = vmatpush2.bf16.msra.mxu1 %v1725_v3  ;;  %1009 = vmatprep.subr.bf16.mxu0 %v1730_v6 }
  0xa2   :  { %1062 = vmatprep.subr.bf16.mxu1 %v1733_v7 }
  0xa4   :  { %1010 = vmatpush2.bf16.msra.mxu0 %v1728_v8 }
  0xa5   :  { %1063 = vmatpush2.bf16.msra.mxu1 %v1731_v9  ;;  %1476 = vmatprep.subr.bf16.mxu0 %v1734_v10 }
  0xa6   :  { %1504 = vmatprep.subr.bf16.mxu1 %v1734_v10 }
  0xa7   :  { %1012 = vmatmul.mubr.bf16.vlgmr.msra.gmra.mxu0 %v1889_v4  ;;  %v1738_v4 = vld [vmem:[#allocation7 + $0x68] sm:$0xff]  }
  0xa8   :  { %1065 = vmatmul.mubr.bf16.vlgmr.msra.gmra.mxu1 %v1891_v5  ;;  %1021 = vmatprep.mubr.bf16.mxu0 %v1895_v26  ;;  %v1739_v5 = vld [vmem:[#allocation7 + $0x28] sm:$0xff]  }
  0xa9   :  { %1074 = vmatprep.mubr.bf16.mxu1 %v1897_v27  ;;  %1477 = vmatpush3.bf16.msra.mxu0 %v1735_v11 }
  0xaa   :  { %1512 = vmatpush3.bf16.msra.mxu1 %v1735_v11  ;;  %1478 = vmatprep.subr.bf16.mxu0 %v1736_v12 }
  0xab   :  { %1505 = vmatprep.subr.bf16.mxu1 %v1736_v12 }
  0xad   :  { %1479 = vmatpush3.bf16.msra.mxu0 %v1737_v13 }
  0xae   :  { %1513 = vmatpush3.bf16.msra.mxu1 %v1737_v13  ;;  %1480 = vmatprep.subr.bf16.mxu0 %v1738_v4 }
  0xaf   :  { %1022 = vmatmul.mubr.bf16.gmra.mxu0 %v1900_v28  ;;  %1506 = vmatprep.subr.bf16.mxu1 %v1738_v4 }
  0xb0   :  { %1075 = vmatmul.mubr.bf16.gmra.mxu1 %v1902_v29 }
  0xb1   :  { %1481 = vmatpush3.bf16.msra.mxu0 %v1739_v5 }
  0xb2   :  { %1514 = vmatpush3.bf16.msra.mxu1 %v1739_v5  ;;  %1482 = vmatprep.subr.bf16.mxu0 %v1740_v14 }
  0xb3   :  { %1507 = vmatprep.subr.bf16.mxu1 %v1740_v14 }
  0xb5   :  { %1483 = vmatpush3.bf16.msra.mxu0 %v1741_v15 }
  0xb6   :  { %1515 = vmatpush3.bf16.msra.mxu1 %v1741_v15  ;;  %1484 = vmatprep.subr.bf16.mxu0 %v1742_v16 }
  0xb7   :  { %1508 = vmatprep.subr.bf16.mxu1 %v1742_v16 }
  0xb9   :  { %1485 = vmatpush3.bf16.msra.mxu0 %v1743_v17 }
  0xba   :  { %1516 = vmatpush3.bf16.msra.mxu1 %v1743_v17  ;;  %1486 = vmatprep.subr.bf16.mxu0 %v1744_v18 }
  0xbb   :  { %1509 = vmatprep.subr.bf16.mxu1 %v1744_v18 }
  0xbd   :  { %1487 = vmatpush3.bf16.msra.mxu0 %v1745_v19 }
  0xbe   :  { %1517 = vmatpush3.bf16.msra.mxu1 %v1745_v19  ;;  %1488 = vmatprep.subr.bf16.mxu0 %v1746_v20 }
  0xbf   :  { %1510 = vmatprep.subr.bf16.mxu1 %v1746_v20 }
  0xc1   :  { %1489 = vmatpush3.bf16.msra.mxu0 %v1747_v21 }
  0xc2   :  { %1518 = vmatpush3.bf16.msra.mxu1 %v1747_v21  ;;  %1490 = vmatprep.subr.bf16.mxu0 %v1748_v22 }
  0xc3   :  { %1511 = vmatprep.subr.bf16.mxu1 %v1748_v22 }
  0xc5   :  { %1491 = vmatpush3.bf16.msra.mxu0 %v1749_v23 }
  0xc6   :  { %1519 = vmatpush3.bf16.msra.mxu1 %v1749_v23 }
 0x127   :  { %v907_v24 = vpop.f32.mrf.mxu0 }
 0x128   :  { %v960_v25 = vpop.f32.mrf.mxu1 }
 0x129   :  { %v909_v26 = vpop.f32.mrf.mxu0  ;;  %v961_v52 = vadd.f32 %v960_v25, %v907_v24 }
 0x12a   :  { %v962_v27 = vpop.f32.mrf.mxu1 }
 0x12b   :  { %v911_v28 = vpop.f32.mrf.mxu0  ;;  %v963_v49 = vadd.f32 %v962_v27, %v909_v26  ;;  %v1085_v1 = vmul.f32 %v961_v52, %v961_v52 }
 0x12c   :  { %v964_v29 = vpop.f32.mrf.mxu1 }
 0x12d   :  { %v913_v30 = vpop.f32.mrf.mxu0  ;;  %v965_v45 = vadd.f32 %v964_v29, %v911_v28  ;;  %v1086_v62 = vmul.f32 %v963_v49, %v963_v49 }
 0x12e   :  { %v966_v31 = vpop.f32.mrf.mxu1 }
 0x12f   :  { %v917_v32 = vpop.f32.mrf.mxu0  ;;  %v967_v50 = vadd.f32 %v966_v31, %v913_v30  ;;  %v1087_v58 = vmul.f32 %v965_v45, %v965_v45 }
 0x130   :  { %v970_v33 = vpop.f32.mrf.mxu1 }
 0x131   :  { %v919_v34 = vpop.f32.mrf.mxu0  ;;  %v1088_v63 = vmul.f32 %v967_v50, %v967_v50  ;;  %v971_v17 = vadd.f32 %v970_v33, %v917_v32 }
 0x132   :  { %v972_v35 = vpop.f32.mrf.mxu1 }
 0x133   :  { %v921_v36 = vpop.f32.mrf.mxu0  ;;  %v973_v5 = vadd.f32 %v972_v35, %v919_v34  ;;  %v1089_v29 = vmul.f32 %v971_v17, %v971_v17 }
 0x134   :  { %v974_v37 = vpop.f32.mrf.mxu1 }
 0x135   :  { %v923_v38 = vpop.f32.mrf.mxu0  ;;  %v975_v10 = vadd.f32 %v974_v37, %v921_v36  ;;  %v1090_v26 = vmul.f32 %v973_v5, %v973_v5 }
 0x136   :  { %v976_v39 = vpop.f32.mrf.mxu1 }
 0x137   :  { %v977_v14 = vadd.f32 %v976_v39, %v923_v38  ;;  %v1091_v24 = vmul.f32 %v975_v10, %v975_v10 }
 0x139   :  { %v1092_v27 = vmul.f32 %v977_v14, %v977_v14 }
 0x167   :  { %v1013_v40 = vpop.f32.mrf.mxu0 }
 0x168   :  { %v1066_v41 = vpop.f32.mrf.mxu1 }
 0x169   :  { %v1015_v42 = vpop.f32.mrf.mxu0  ;;  %v1067_v46 = vadd.f32 %v1066_v41, %v1013_v40 }
 0x16a   :  { %v1068_v43 = vpop.f32.mrf.mxu1 }
 0x16b   :  { %v1069_v44 = vadd.f32 %v1068_v43, %v1015_v42  ;;  %v1017_v47 = vpop.f32.mrf.mxu0  ;;  %v1093_v59 = vmul.f32 %v1067_v46, %v1067_v46 }
 0x16c   :  { %v1070_v48 = vpop.f32.mrf.mxu1 }
 0x16d   :  { %v1071_v51 = vadd.f32 %v1070_v48, %v1017_v47  ;;  %v1019_v53 = vpop.f32.mrf.mxu0  ;;  %v1094_v55 = vmul.f32 %v1069_v44, %v1069_v44  ;;  %v1101_v11 = vadd.f32 %v1093_v59, %v1085_v1 }
 0x16e   :  { %v1072_v54 = vpop.f32.mrf.mxu1 }
 0x16f   :  { %v1095_v56 = vmul.f32 %v1071_v51, %v1071_v51  ;;  %v1073_v57 = vadd.f32 %v1072_v54, %v1019_v53  ;;  %v1023_v60 = vpop.f32.mrf.mxu0  ;;  %v1102_v7 = vadd.f32 %v1094_v55, %v1086_v62 }
 0x170   :  { %v1076_v61 = vpop.f32.mrf.mxu1 }
 0x171   :  { %v1096_v0 = vmul.f32 %v1073_v57, %v1073_v57  ;;  %v1103_v2 = vadd.f32 %v1095_v56, %v1087_v58  ;;  %v1025_v3 = vpop.f32.mrf.mxu0  ;;  %v1077_v12 = vadd.f32 %v1076_v61, %v1023_v60 }
 0x172   :  { %v1078_v6 = vpop.f32.mrf.mxu1 }
 0x173   :  { %v1104_v8 = vadd.f32 %v1096_v0, %v1088_v63  ;;  %v1079_v9 = vadd.f32 %v1078_v6, %v1025_v3  ;;  %v1027_v13 = vpop.f32.mrf.mxu0  ;;  %v1109_v18 = vpack.c.bf16 %v1103_v2, %v1101_v11  ;;  %v1097_v25 = vmul.f32 %v1077_v12, %v1077_v12 }
 0x174   :  { %v1080_v4 = vpop.f32.mrf.mxu1 }
 0x175   :  { %v1081_v15 = vadd.f32 %v1080_v4, %v1027_v13  ;;  %v1110_v16 = vpack.c.bf16 %v1104_v8, %v1102_v7  ;;  %v1029_v19 = vpop.f32.mrf.mxu0  ;;  %v1098_v21 = vmul.f32 %v1079_v9, %v1079_v9  ;;  %v1105_v35 = vadd.f32 %v1097_v25, %v1089_v29 }
 0x176   :  { %v1082_v20 = vpop.f32.mrf.mxu1 }
 0x177   :  { %v1099_v22 = vmul.f32 %v1081_v15, %v1081_v15  ;;  %v1083_v23 = vadd.f32 %v1082_v20, %v1029_v19  ;;  %1273 = vmatprep.mubr.bf16.mxu0 %v1110_v16  ;;  %v1106_v31 = vadd.f32 %v1098_v21, %v1090_v26 }
 0x178   :  { %1274 = vmatmul.mubr.bf16.vlgmr.msra.gmra.mxu0 %v1109_v18 }
 0x179   :  { %v1100_v28 = vmul.f32 %v1083_v23, %v1083_v23  ;;  %v1107_v30 = vadd.f32 %v1099_v22, %v1091_v24 }
 0x17b   :  { %v1108_v34 = vadd.f32 %v1100_v28, %v1092_v27  ;;  %v1111_v32 = vpack.c.bf16 %v1107_v30, %v1105_v35 }
 0x17d   :  { %v1112_v36 = vpack.c.bf16 %v1108_v34, %v1106_v31 }
 0x17f   :  { %1281 = vmatprep.mubr.bf16.mxu1 %v1112_v36 }
 0x180   :  { %1282 = vmatmul.mubr.bf16.vlgmr.msra.gmra.mxu1 %v1111_v32 }
 0x238   :  { %v1492_v33 = vpop.f32.mrf.mxu0 }
 0x23a   :  { %v1493_v37 = vpop.f32.mrf.mxu0 }
 0x23b   :  { %v1494_v38 = vadd.f32 %v1493_v37, %v1492_v33 }
 0x23c   :  { %v1495_v39 = vpop.f32.mrf.mxu0 }
 0x23d   :  { %v1290_v40 = vmax.f32 %v1494_v38, 1e-09 }
 0x23e   :  { %v1496_v41 = vpop.f32.mrf.mxu0 }
 0x23f   :  { %1750 = vlog2.f32 %v1290_v40  ;;  %v1497_v42 = vadd.f32 %v1496_v41, %v1495_v39 }
 0x240   :  { %v1498_v43 = vpop.f32.mrf.mxu1 }
 0x241   :  { %v1291_v44 = vmax.f32 %v1497_v42, 1e-09 }
 0x242   :  { %v1499_v45 = vpop.f32.mrf.mxu1 }
 0x243   :  { %1752 = vlog2.f32 %v1291_v44  ;;  %v1500_v46 = vadd.f32 %v1499_v45, %v1498_v43 }
 0x244   :  { %v1501_v47 = vpop.f32.mrf.mxu1 }
 0x245   :  { %v1292_v48 = vmax.f32 %v1500_v46, 1e-09 }
 0x246   :  { %v1502_v49 = vpop.f32.mrf.mxu1 }
 0x247   :  { %1754 = vlog2.f32 %v1292_v48  ;;  %v1503_v50 = vadd.f32 %v1502_v49, %v1501_v47 }
 0x249   :  { %v1293_v51 = vmax.f32 %v1503_v50, 1e-09 }
 0x24b   :  { %1756 = vlog2.f32 %v1293_v51 }
 0x24c   :  { %v1751_v52 = vpop.eup %1750 }
 0x24d   :  { %v1295_v53 = vmul.f32 0.6931472, %v1751_v52 }
 0x24f   :  { %1302 = vst [vmem:[#allocation8] sm:$0xff] %v1295_v53 }
 0x250   :  { %v1753_v54 = vpop.eup %1752 }
 0x251   :  { %v1297_v55 = vmul.f32 0.6931472, %v1753_v54 }
 0x253   :  { %1303 = vst [vmem:[#allocation8 + $0x8] sm:$0xff] %v1297_v55 }
 0x254   :  { %v1755_v56 = vpop.eup %1754 }
 0x255   :  { %v1299_v57 = vmul.f32 0.6931472, %v1755_v56 }
 0x257   :  { %1304 = vst [vmem:[#allocation8 + $0x10] sm:$0xff] %v1299_v57 }
 0x258   :  { %v1757_v58 = vpop.eup %1756 }
 0x259   :  { %v1301_v59 = vmul.f32 0.6931472, %v1757_v58 }
 0x25b   :  { %1305 = vst [vmem:[#allocation8 + $0x18] sm:$0xff] %v1301_v59 }
 0x25c   :  { %1829 = shalt.err (!%p1826_p5)
}
 0x25d   :  { %s1852_s4 = smov 128   ;;  %s1853_s5 = smov 8  }
 0x25e   :  { %1317 = dma.vmem_to_hbm [thread:$0]  %s1312_s2, 512, %s1921_s3, [#allocation4], %s1852_s4, %s1852_s4, %s1853_s5  }
 0x25f   :  { %1842 = dma.done.wait [#allocation4], 512  }
 0x260   :  { %1843 = vsyncadd [#allocation4], 4294966784 }
 0x261   :  { %1321 = vsyncpa [#allocation3], 1 }
 0x262   :  { %1322 = vsyncpa [#allocation6], 1 }
 0x263   :  { %1323 = vsyncpa [#allocation4], 1 }

</bundles_post_ra>
